<compile_context>
chip_gen: v7x
topology: tpu7x:2x2x1
jax: 0.10.0
libtpu: 0.0.40
codegen_flags: <defaults>
</compile_context>

<pallas_src>
import functools

import numpy as np
import jax
import jax.numpy as jnp
from jax import lax
from jax.experimental import pallas as pl
from jax.experimental.pallas import tpu as pltpu

NEG_BIG = -1e30          # additive mask value; stays in the f32 score path
LEAKY_SLOPE = 0.01       # torch.nn.functional.leaky_relu default (DGL EGATConv)


# ----------------------------------------------------------------------------
# Pallas kernels
# ----------------------------------------------------------------------------
def _proj_kernel(x_ref, w_ref, b_ref, p_ref):
    """Fused node projections: p = x @ [W_ni | W_nj | W_node] + [0 | e_bias | b_node].

    One lane-dense output is emitted; the cheap column splits / transposes are
    done in XLA glue (avoids narrow in-kernel lane slices)."""
    p_ref[...] = jnp.dot(x_ref[...].astype(jnp.bfloat16), w_ref[...],
                         preferred_element_type=jnp.float32) + b_ref[...]


def _egat_attn_kernel(fnjb_ref, fni_ref, hnode_ref, ef_ref, mask_ref,
                      wg_ref, attn_ref, out_ref, *, T, N, H, Fe, G):
    """One destination-row tile of: edge projection, edge attention, masked
    softmax over src, head-fused aggregation, head-sum + ELU.
    Matches DGL EGATConv + .sum(dim=1) + ELU in SAGKT.forward.

    Layout: src (N) sits on lanes everywhere; the logit slab is (T, HFe, N)."""
    HFe = H * Fe
    Ein = ef_ref.shape[0] // T
    TG = T // G

    # ---- edge projection on the MXU (grouped, block-diagonal weight) -------
    # ef rows are (dst, ein)-major with src on lanes; G dst rows per batched
    # contraction against kron(I_G, W_fij^T) keep MXU tiles big (K = G*Ein).
    ef_g = ef_ref[...].reshape(TG, G * Ein, N)                    # bf16, free split
    wg_b = jnp.broadcast_to(wg_ref[...], (TG, G * HFe, G * Ein))  # bf16
    fij = lax.dot_general(wg_b, ef_g,
                          dimension_numbers=(((2,), (1,)), ((0,), (0,))),
                          preferred_element_type=jnp.float32)     # (TG, G*HFe, N)
    fij = fij.reshape(T, HFe, N)                                  # pure re-label

    # ---- edge logits: f[t, c, n] = f_ni[src n] + f_nj[dst t](+bias) + f_ij --
    f = fij + fni_ref[...][None, :, :] + fnjb_ref[...][:, :, None]
    f = jnp.where(f > 0, f, LEAKY_SLOPE * f)                      # LeakyReLU(0.01)
    fw = f * attn_ref[...].reshape(1, HFe, 1)                     # attn applied once

    mask = mask_ref[...]                                          # (T, N)
    a_heads = []
    for h in range(H):                                            # static unroll
        # per-head score: reduce the attn-weighted logits over the Fe sublanes;
        # result lands directly in (T, N) with src on lanes for the softmax.
        s = jnp.sum(fw[:, h * Fe:(h + 1) * Fe, :], axis=1)        # (T, N)
        s = jnp.where(mask > 0, s, NEG_BIG)
        m = jnp.max(s, axis=-1, keepdims=True)
        p = jnp.exp(s - m) * mask            # keep *mask: all-masked rows -> 0
        denom = jnp.sum(p, axis=-1, keepdims=True)
        a = p * pl.reciprocal(jnp.maximum(denom, 1e-20), approx=True)  # EUP
        a_heads.append(a.astype(jnp.bfloat16))

    # ---- head-fused aggregation: one K = H*N MXU contraction ----------------
    a_cat = jnp.concatenate(a_heads, axis=-1)                     # (T, H*N) bf16
    acc = jnp.dot(a_cat, hnode_ref[...], preferred_element_type=jnp.float32)
    # head-sum already folded into the contraction; ELU (alpha = 1)
    out_ref[...] = jnp.where(acc > 0, acc, jnp.exp(jnp.minimum(acc, 0.0)) - 1.0)


def _mlp_head_kernel(x_ref, w1_ref, b1_ref, w2_ref, b2_ref, out_ref):
    """sigmoid(lin2(dropout(relu(lin1(x)))))  — dropout is identity at inference."""
    h = jnp.dot(x_ref[...].astype(jnp.bfloat16), w1_ref[...],
                preferred_element_type=jnp.float32) + b1_ref[...]
    h = jnp.maximum(h, 0.0)
    # TODO(synk): nn.Dropout(0.5) treated as inference-mode identity (no RNG dropout).
    y = jnp.dot(h.astype(jnp.bfloat16), w2_ref[...],
                preferred_element_type=jnp.float32) + b2_ref[...]
    out_ref[...] = 1.0 / (1.0 + jnp.exp(-y))


# ----------------------------------------------------------------------------
# pallas_call wrappers
# ----------------------------------------------------------------------------
def _vmem_spec():
    return pl.BlockSpec(memory_space=pltpu.MemorySpace.VMEM)


def _vmem_capacity_bytes():
    try:
        return int(pltpu.get_tpu_info().vmem_capacity_bytes)
    except Exception:
        return 64 * 1024 * 1024          # conservative (v7x per-TC VMEM)


def _pick_dst_tile(N, Ein, HFe, H, budget_bytes, cap=128):
    """Largest multiple-of-8 divisor of N that fits the per-tile VMEM budget,
    capped so the dst grid keeps >=2 tiles (feeds both TensorCores on v7x)."""
    if N < 8:
        return N
    # rough per-dst-row VMEM bytes: double-buffered bf16 edge block +
    # ~3 live f32 copies of the (HFe, N) logit slab + softmax temporaries.
    per_row = 2 * Ein * N * 2 + 3 * HFe * N * 4 + 8 * H * N * 4
    cap = min(cap, max(8, budget_bytes // max(per_row, 1)))
    if N >= 16:
        cap = min(cap, N // 2)
    cap = max(8, (cap // 8) * 8)
    best = N                                  # fallback: single tile
    t = 8
    while t <= min(N, cap):
        if N % t == 0:
            best = t
        t += 8
    return best


def fused_projection(x, w_proj, b_proj):
    N = x.shape[0]
    Dtot = w_proj.shape[1]
    return pl.pallas_call(
        _proj_kernel,
        out_shape=jax.ShapeDtypeStruct((N, Dtot), jnp.float32),
        in_specs=[_vmem_spec()] * 3,
        out_specs=_vmem_spec(),
    )(x, w_proj, b_proj)


def egat_layer(fnjb, fni_t, hnode_hm, ef_packed, mask, w_fij, attn_col,
               *, N, H, Fe, Fn, tile_dst=None):
    HFe = H * Fe
    Ein = w_fij.shape[0]

    vmem_cap = _vmem_capacity_bytes()
    vmem_limit = min(int(vmem_cap * 0.75), 112 * 1024 * 1024)
    if tile_dst is not None and N % tile_dst == 0 and tile_dst % 8 == 0:
        T = tile_dst
    else:
        T = _pick_dst_tile(N, Ein, HFe, H, int(vmem_limit * 0.6))
    num_tiles = N // T
    G = 8 if T % 8 == 0 else (4 if T % 4 == 0 else (2 if T % 2 == 0 else 1))

    # block-diagonal edge-projection weight (built in XLA, tiny, bf16):
    # Wg[(ti, c), (tj, e)] = W_fij[e, c] if ti == tj else 0
    wg = jnp.kron(jnp.eye(G, dtype=jnp.bfloat16), w_fij.T)        # (G*HFe, G*Ein)

    kernel = functools.partial(_egat_attn_kernel, T=T, N=N, H=H, Fe=Fe, G=G)
    grid_spec = pltpu.PrefetchScalarGridSpec(
        num_scalar_prefetch=0,
        grid=(num_tiles,),
        in_specs=[
            pl.BlockSpec((T, HFe), lambda i: (i, 0)),           # fnjb (+edge bias): dst rows
            pl.BlockSpec((HFe, N), lambda i: (0, 0)),           # fni^T : grid-invariant
            pl.BlockSpec((H * N, Fn), lambda i: (0, 0)),        # hnode head-major bf16
            pl.BlockSpec((T * Ein, N), lambda i: (i, 0)),       # edge feats bf16, src on lanes
            pl.BlockSpec((T, N), lambda i: (i, 0)),             # adjacency mask, dst rows
            pl.BlockSpec((G * HFe, G * Ein), lambda i: (0, 0)), # block-diag W_fij^T bf16
            pl.BlockSpec((HFe, 1), lambda i: (0, 0)),           # attention vector
        ],
        out_specs=pl.BlockSpec((T, Fn), lambda i: (i, 0)),
    )
    return pl.pallas_call(
        kernel,
        out_shape=jax.ShapeDtypeStruct((N, Fn), jnp.float32),
        grid_spec=grid_spec,
        compiler_params=pltpu.CompilerParams(
            dimension_semantics=("parallel",),     # dst tiles split across TCs (v7x)
            vmem_limit_bytes=vmem_limit),
    )(fnjb, fni_t, hnode_hm, ef_packed, mask, wg, attn_col)


def mlp_head(x, mp):
    B = x.shape[0]
    return pl.pallas_call(
        _mlp_head_kernel,
        out_shape=jax.ShapeDtypeStruct((B, 1), jnp.float32),
        in_specs=[_vmem_spec()] * 5,
        out_specs=_vmem_spec(),
    )(x, mp["w1"], mp["b1"], mp["w2"], mp["b2"])


# ----------------------------------------------------------------------------
# Parameters (deterministic synthetic init, shapes from SAGKT.__init__)
# ----------------------------------------------------------------------------
def _uniform(key, shape, bound):
    return jax.random.uniform(key, shape, jnp.float32, -bound, bound)


def init_params(key, in_nfeats, in_efeats, latent_dim, num_heads=4, out_edge_feats=8):
    dims = [in_nfeats] + list(latent_dim)
    H, Fe = num_heads, out_edge_feats
    HFe = H * Fe
    layers = []
    for i in range(len(dims) - 1):
        din, fn = dims[i], dims[i + 1]
        key, *ks = jax.random.split(key, 8)
        w_ni = _uniform(ks[0], (din, HFe), 1.0 / np.sqrt(din))
        w_nj = _uniform(ks[1], (din, HFe), 1.0 / np.sqrt(din))
        w_node = _uniform(ks[4], (din, H * fn), 1.0 / np.sqrt(din))
        e_bias = jnp.zeros((1, HFe), jnp.float32)
        b_node = _uniform(ks[5], (1, H * fn), 1.0 / np.sqrt(din))
        layers.append(dict(
            # fused node projection, output layout [fni | fnj(+edge bias) | hnode];
            # MXU weight pre-cast to bf16 (no in-kernel casts)
            w_proj=jnp.concatenate([w_ni, w_nj, w_node], axis=1).astype(jnp.bfloat16),
            b_proj=jnp.concatenate(
                [jnp.zeros((1, HFe), jnp.float32), e_bias, b_node], axis=1),
            w_fij=_uniform(ks[2], (in_efeats, HFe),
                           1.0 / np.sqrt(in_efeats)).astype(jnp.bfloat16),
            attn_col=_uniform(ks[3], (H, Fe),
                              np.sqrt(6.0 / (Fe + 1))).reshape(HFe, 1),
            fn=fn,
        ))
    s = sum(dims[1:])                 # sum(latent_dim[1:]) after insert(0, in_nfeats)
    key, k1, k2, k3, k4 = jax.random.split(key, 5)
    mlp = dict(
        w1=_uniform(k1, (2 * s, 128), 1.0 / np.sqrt(2 * s)).astype(jnp.bfloat16),
        b1=_uniform(k2, (1, 128), 1.0 / np.sqrt(2 * s)),
        w2=_uniform(k3, (128, 1), 1.0 / np.sqrt(128)).astype(jnp.bfloat16),
        b2=_uniform(k4, (1, 1), 1.0 / np.sqrt(128)),
    )
    return dict(egat=layers, mlp=mlp, num_heads=num_heads, out_edge_feats=out_edge_feats)


# ----------------------------------------------------------------------------
# SAGKT forward
# ----------------------------------------------------------------------------
def sagkt_forward(params, node_x, efeat, mask, user_idx, item_idx, tile_dst=None):
    N = node_x.shape[0]
    H = params["num_heads"]
    Fe = params["out_edge_feats"]
    HFe = H * Fe
    Ein = efeat.shape[-1]

    # One-time host/XLA repacks (amortized over all EGAT layers):
    #   edges -> (dst, ein)-major rows with src on lanes, single bf16 cast
    ef_packed = efeat.transpose(0, 2, 1).reshape(N * Ein, N).astype(jnp.bfloat16)
    mask = mask.astype(jnp.float32)               # mask[dst, src]

    x = node_x.astype(jnp.float32)
    states = []
    for lp in params["egat"]:
        Fn = lp["fn"]
        p = fused_projection(x, lp["w_proj"], lp["b_proj"])       # (N, 2*HFe + H*Fn)
        # tiny XLA-side layout plumbing, once per layer:
        fni_t = p[:, :HFe].T                                      # (HFe, N) f32
        fnjb = p[:, HFe:2 * HFe]                                  # (N, HFe) f32
        hnode_hm = (p[:, 2 * HFe:].reshape(N, H, Fn)              # head-major (H*N, Fn)
                    .transpose(1, 0, 2).reshape(H * N, Fn)
                    .astype(jnp.bfloat16))
        x = egat_layer(fnjb, fni_t, hnode_hm, ef_packed, mask,
                       lp["w_fij"], lp["attn_col"],
                       N=N, H=H, Fe=Fe, Fn=Fn, tile_dst=tile_dst)
        states.append(x)
    states = jnp.concatenate(states, axis=1)                      # (N, sum latent_dim)
    # subgraph_embedding_from == 'user_item': concat user-node and item-node rows
    sub = jnp.concatenate([states[user_idx], states[item_idx]], axis=1)  # (B, 2*sum)
    out = mlp_head(sub, params["mlp"])                            # (B, 1)
    return out[:, 0]


# ----------------------------------------------------------------------------
# Example run
# ----------------------------------------------------------------------------
if __name__ == "__main__":
    key = jax.random.PRNGKey(0)
    B, Nsub = 2, 16                      # 2 subgraphs of 16 nodes each
    N = B * Nsub                         # 32 nodes total
    in_nfeats, in_efeats = 16, 8
    latent_dim = [32, 32]

    kp, kx, ke, ka = jax.random.split(key, 4)
    params = init_params(kp, in_nfeats, in_efeats, latent_dim)

    node_x = jax.random.normal(kx, (N, in_nfeats), jnp.float32)
    efeat = jax.random.normal(ke, (N, N, in_efeats), jnp.float32)

    # block-diagonal adjacency (no edges across subgraphs) + self loops
    block = np.zeros((N, N), dtype=bool)
    for b in range(B):
        block[b * Nsub:(b + 1) * Nsub, b * Nsub:(b + 1) * Nsub] = True
    rand_adj = np.array(jax.random.uniform(ka, (N, N)) < 0.35)
    adj = (block & (rand_adj | np.eye(N, dtype=bool))).astype(np.float32)
    mask = jnp.asarray(adj)              # mask[dst, src]

    # ntype convention: node 0 of each subgraph is the user, node 1 the item
    user_idx = jnp.array([b * Nsub for b in range(B)], dtype=jnp.int32)
    item_idx = jnp.array([b * Nsub + 1 for b in range(B)], dtype=jnp.int32)

    # auto tile pick gives T=16 -> a 2-step "parallel" destination-row grid
    out = sagkt_forward(params, node_x, efeat, mask, user_idx, item_idx)
    out = jax.block_until_ready(out)
    assert out.shape == (B,)
    assert bool(jnp.all(jnp.isfinite(out)))
    assert bool(jnp.all((out >= 0.0) & (out <= 1.0)))
    print("KERNEL_OK")
</pallas_src>

<mosaic_0001>
module attributes {stable_mosaic.version = 11 : i64} {
  func.func @_proj_kernel(%arg0: memref<32x16xf32, #tpu.memory_space<vmem>>, %arg1: memref<16x192xbf16, #tpu.memory_space<vmem>>, %arg2: memref<1x192xf32, #tpu.memory_space<vmem>>, %arg3: memref<32x192xf32, #tpu.memory_space<vmem>>) attributes {dimension_semantics = [], scalar_prefetch = 0 : i64, scratch_operands = 0 : i64, tpu.core_type = #tpu.core_type<tc>} {
    %c0 = arith.constant 0 : index
    %c0_0 = arith.constant 0 : index
    %0 = vector.load %arg0[%c0, %c0_0] : memref<32x16xf32, #tpu.memory_space<vmem>>, vector<32x16xf32>
    %1 = arith.truncf %0 : vector<32x16xf32> to vector<32x16xbf16>
    %c0_1 = arith.constant 0 : index
    %c0_2 = arith.constant 0 : index
    %2 = vector.load %arg1[%c0_1, %c0_2] : memref<16x192xbf16, #tpu.memory_space<vmem>>, vector<16x192xbf16>
    %cst = arith.constant dense<0.000000e+00> : vector<32x192xf32>
    %3 = tpu.matmul %1, %2, %cst {dimension_numbers = #tpu.dot_dimension_numbers<[1], [0], [0], [1], [0, 0, 1, 1], [], []>} : vector<32x16xbf16>, vector<16x192xbf16>, vector<32x192xf32> -> vector<32x192xf32>
    %c0_3 = arith.constant 0 : index
    %c0_4 = arith.constant 0 : index
    %4 = vector.load %arg2[%c0_3, %c0_4] : memref<1x192xf32, #tpu.memory_space<vmem>>, vector<1x192xf32>
    %5 = vector.broadcast %4 : vector<1x192xf32> to vector<32x192xf32>
    %6 = arith.addf %3, %5 : vector<32x192xf32>
    %c0_5 = arith.constant 0 : index
    %c0_6 = arith.constant 0 : index
    %7 = vector.load %arg3[%c0_5, %c0_6] : memref<32x192xf32, #tpu.memory_space<vmem>>, vector<32x192xf32>
    tpu.vector_store %arg3[%c0_5, %c0_6], %6 {strides = array<i32>} : memref<32x192xf32, #tpu.memory_space<vmem>>, vector<32x192xf32>,
    return
  }
}

</mosaic_0001>

<bundles_post_ra>
// kernel: tpu_custom_call.1
= control target key start
LH: loop header
LB: loop body
LE: loop exit
PB: predicated region body
PF: predicated region fallthrough
CT: control target
= control target key end

     0   :  { %v168_v2 = vmov 0   ;;  %vm46_vm0 = vcmask 130048   ;;  %s229_s0 = inlined_call_operand.vmem [shape: f32[32,16], index: 0, kind: input, shape index: {}]   ;;  %s230_s1 = inlined_call_operand.vmem [shape: bf16[16,192], index: 1, kind: input, shape index: {}]   ;;  %s231_s2 = inlined_call_operand.vmem [shape: f32[1,192], index: 2, kind: input, shape index: {}]   ;;  %s232_s3 = inlined_call_operand.hbm [shape: f32[32,192], index: 3, kind: output, shape index: {}]  }
   0x1   :  { %v141_v0 = vld [vmem:[%s230_s1 + $0x4] ss:$8 sps:$4 sm:$0xff]   ;;  %v143_v1 = vld [vmem:[%s230_s1] ss:$8 sps:$4 sm:$0xff]   ;;  %85 = vmatprep.mubr.bf16.mxu0 %v168_v2  ;;  %95 = vmatprep.mubr.bf16.mxu1 %v168_v2  ;;  %v18_v6 = vld [vmem:[%s229_s0 + $0x10] sm:$0xff] }
   0x2   :  { %v16_v3 = vld [vmem:[%s229_s0] sm:$0xff]  ;;  %v17_v4 = vld [vmem:[%s229_s0 + $0x8] sm:$0xff]  ;;  %53 = vmatprep.subr.bf16.mxu0 %v141_v0  ;;  %135 = vmatprep.subr.bf16.mxu1 %v141_v0  ;;  %v19_v7 = vld [vmem:[%s229_s0 + $0x18] sm:$0xff] }
   0x3   :  { %v20_v5 = vpack.c.bf16 %v17_v4, %v16_v3  ;;  %54 = vmatpush1.bf16.msra.mxu0 %v143_v1  ;;  %136 = vmatpush1.bf16.msra.mxu1 %v143_v1  ;;  %v21_v8 = vpack.c.bf16 %v19_v7, %v18_v6 }
   0x4   :  { %8 = vsyncpa [#allocation3], 0  ;;  %v26_v9 = vlaneseq  ;;  %v24_v12 = vld [vmem:[%s231_s2] sm:$0x3]  ;;  %s169_s0 = smov [#allocation2]   ;;  %vm107_vm1 = vcmask 523264  }
   0x5   :  { %s120_s25 = sshll.u32 %s169_s0, 4  ;;  %s121_s25 = int_to_ptr.vmem [resolvable:$true] %s120_s25 }
   0x6   :  { %133 = vmatmul.mubr.msk.bf16.vlgmr.msra.gmra.mrb[0].mxu0 %vm46_vm0, %v20_v5  ;;  %134 = vmatmul.mubr.msk.bf16.vlgmr.msra.gmra.mrb[0].mxu1 %vm46_vm0, %v21_v8  ;;  %v27_v10 = vshrl.u32 %v26_v9, 7  ;;  %s144_s2 = scalar_lea.vmem %s121_s25, 1024  ;;  %p149_p1 = scmp.lt.s32.totalorder %s121_s25, %s121_s25 }
   0x7   :  { %p145_p0 = scmp.ne.s32.totalorder %s121_s25, %s144_s2  ;;  %p150_p2 = scmp.lt.s32.totalorder %s144_s2, %s144_s2 }
   0x8   :  { %v28_v11 = vsub.s32 0, %v27_v10  ;;  %v32_v13 = vsub.s32 1, %v27_v10 }
   0x9   :  { %p151_p3 = por %p150_p2, %p149_p1 }
   0xa   :  { %v29_v14 = vrot.slane %v24_v12, %v28_v11  ;;  %v33_v15 = vrot.slane %v24_v12, %v32_v13 }
   0xb   :  { %p152_p4 = pnand %p151_p3, %p145_p0 }
  0xd9   :  { %v87_v16 = vpop.f32.mrb[0].mxu0  ;;  %v97_v17 = vpop.f32.mrb[0].mxu1 }
  0xda   :  { %v88_v18 = vadd.f32 %v87_v16, %v29_v14  ;;  %v98_v19 = vadd.f32 %v97_v17, %v29_v14  ;;  %v89_v20 = vpop.f32.mrb[1].mxu0  ;;  %v99_v21 = vpop.f32.mrb[1].mxu1 }
  0xdb   :  { %v90_v22 = vadd.f32 %v89_v20, %v33_v15  ;;  %v100_v23 = vadd.f32 %v99_v21, %v33_v15  ;;  %v91_v24 = vpop.f32.mrb[2].mxu0  ;;  %v101_v25 = vpop.f32.mrb[2].mxu1 }
  0xdc   :  { %106 = vst [vmem:[#allocation2] sm:$0xff] %v88_v18  ;;  %111 = vst [vmem:[#allocation2 + $0x20] sm:$0xff] %v98_v19  ;;  %v92_v26 = vadd.f32 %v91_v24, %v29_v14  ;;  %v102_v27 = vadd.f32 %v101_v25, %v29_v14  ;;  %v93_v28 = vpop.f32.mrb[3].mxu0  ;;  %v103_v29 = vpop.f32.mrb[3].mxu1 }
  0xdd   :  { %108 = vst.msk [vmem:[#allocation2 + $0x8] sm:$0xff] %vm107_vm1, %v90_v22  ;;  %112 = vst.msk [vmem:[#allocation2 + $0x28] sm:$0xff] %vm107_vm1, %v100_v23  ;;  %v94_v30 = vadd.f32 %v93_v28, %v33_v15  ;;  %v104_v31 = vadd.f32 %v103_v29, %v33_v15 }
  0xde   :  { %109 = vst [vmem:[#allocation2 + $0x10] sm:$0xff] %v92_v26  ;;  %113 = vst [vmem:[#allocation2 + $0x30] sm:$0xff] %v102_v27 }
  0xdf   :  { %110 = vst.msk [vmem:[#allocation2 + $0x18] sm:$0xff] %vm107_vm1, %v94_v30  ;;  %114 = vst.msk [vmem:[#allocation2 + $0x38] sm:$0xff] %vm107_vm1, %v104_v31 }
  0xe0   :  { %155 = shalt.err (!%p152_p4)
}
  0xe1   :  { %s156_s28 = scalar_lea.hbm %s232_s3, 1024 }
  0xe2   :  { %p157_p5 = scmp.ne.s32.totalorder %s232_s3, %s156_s28  ;;  %p160_p6 = scmp.lt.u32.totalorder %s156_s28, %s232_s3 }
  0xe4   :  { %p162_p7 = pnand %p160_p6, %p157_p5 }
  0xe6   :  { %165 = shalt.err (!%p162_p7)
}
  0xe7   :  { %s170_s6 = smov 256   ;;  %s171_s7 = smov 16  }
  0xe8   :  { %126 = dma.vmem_to_hbm [thread:$0]  %s121_s25, 1024, %s232_s3, [#allocation3], %s170_s6, %s170_s6, %s171_s7  }
  0xe9   :  { %166 = dma.done.wait [#allocation3], 1024  }
  0xea   :  { %167 = vsyncadd [#allocation3], 4294966272 }
  0xeb   :  { %130 = vsyncpa [#allocation3], 1 }

</bundles_post_ra>
